<compile_context>
chip_gen: v7x
topology: tpu7x:2x2x1
jax: 0.10.0
libtpu: 0.0.40
codegen_flags: <defaults>
</compile_context>

<pallas_src>
import jax
import jax.numpy as jnp
from jax import lax
from jax.experimental import pallas as pl
from jax.experimental.pallas import tpu as pltpu

_BN_EPS = 1e-5
_VMEM_BUDGET = 20 << 20  # conservative: fits v7x's 32 MiB scoped-VMEM default


def _round_up(x, m):
    return (x + m - 1) // m * m


def _pick_tm(n, want, row_bytes, resident_bytes):
    """Largest row tile <= `want` whose double-buffered tiles fit the budget."""
    tm = min(want, _round_up(n, 8))
    budget = max(_VMEM_BUDGET - resident_bytes, 2 << 20)
    while tm > 256 and 2 * tm * row_bytes > budget:
        tm //= 2
    return max(_round_up(tm, 8), 8)


def gin_aggr_net(x, w1, b1, gamma, beta, w2, b2, *,
                 tm_apply=1024, tm_stats=2048, fuse_max_rows=1024,
                 use_bf16=False):
    """Pallas forward of GINAggrNet.  x: [N, D_in] -> [N, D_out].

    Weights are stored transposed w.r.t. PyTorch (w1: [D_in, H], w2: [H, D_out]).
    b1 is accepted for API parity but is mathematically cancelled by
    training-mode BatchNorm, so the kernels never touch it.
    """
    del b1  # exactly cancelled by training-mode BN mean subtraction

    n, d_in = x.shape
    hdim = w1.shape[1]
    d_out = w2.shape[1]

    f32 = jnp.float32
    cdt = jnp.bfloat16 if use_bf16 else f32      # MXU input dtype for x / W1
    hp = _round_up(hdim, 128)                    # lane-pad hidden dim
    dp = _round_up(d_out, 128)                   # lane-pad output dim
    p = max(hp, dp)
    inv_n = 1.0 / float(n)
    itemsize = jnp.dtype(cdt).itemsize

    # ---- tiny parameter prep (all << 1 MiB, done once in the wrapper) -----
    x_c = x if x.dtype == cdt else x.astype(cdt)
    w1_p = w1.astype(f32)
    if hp != hdim:
        w1_p = jnp.pad(w1_p, ((0, 0), (0, hp - hdim)))
    w2_p = w2.astype(f32)
    if hp != hdim or dp != d_out:
        w2_p = jnp.pad(w2_p, ((0, hp - hdim), (0, dp - d_out)))
    gamma_p = gamma.astype(f32)
    beta_p = beta.astype(f32)
    if hp != hdim:
        # gamma padded with 0 => padded-lane scale is 0 => lanes stay exactly 0.
        gamma_p = jnp.pad(gamma_p, (0, hp - hdim))
        beta_p = jnp.pad(beta_p, (0, hp - hdim))
    b2_p = b2.astype(f32)
    if dp != d_out:
        b2_p = jnp.pad(b2_p, (0, dp - d_out))

    w_resident = (d_in * hp) * itemsize + hp * dp * 4 + 8 * p * 4

    # =================== fused fast path (small batches) ====================
    fused_bytes = n * (d_in * itemsize + (2 * hp + dp) * 4) + w_resident
    if n <= fuse_max_rows and fused_bytes <= _VMEM_BUDGET:
        prm = jnp.zeros((8, p), f32)             # one DMA for gamma/beta/b2
        prm = prm.at[0, :hp].set(gamma_p)
        prm = prm.at[1, :hp].set(beta_p)
        prm = prm.at[2, :dp].set(b2_p)

        def fused_kernel(x_ref, w1_ref, prm_ref, w2_ref, o_ref):
            h = jnp.dot(x_ref[...], w1_ref[...],
                        preferred_element_type=jnp.float32)
            mean = jnp.mean(h, axis=0, keepdims=True)
            var = jnp.mean(h * h, axis=0, keepdims=True) - mean * mean
            scale = prm_ref[0:1, :hp] * lax.rsqrt(var + _BN_EPS)
            shift = prm_ref[1:2, :hp] - mean * scale
            a = jnp.maximum(h * scale + shift, 0.0)        # folded BN + ReLU
            out = jnp.dot(a, w2_ref[...], preferred_element_type=jnp.float32)
            o_ref[...] = jnp.maximum(out + prm_ref[2:3, :dp], 0.0).astype(o_ref.dtype)

        out_p = pl.pallas_call(
            fused_kernel,
            out_shape=jax.ShapeDtypeStruct((n, dp), x.dtype),
            grid=(1,),
            in_specs=[
                pl.BlockSpec((n, d_in), lambda i: (0, 0)),
                pl.BlockSpec((d_in, hp), lambda i: (0, 0)),
                pl.BlockSpec((8, p), lambda i: (0, 0)),
                pl.BlockSpec((hp, dp), lambda i: (0, 0)),
            ],
            out_specs=pl.BlockSpec((n, dp), lambda i: (0, 0)),
            compiler_params=pltpu.CompilerParams(
                dimension_semantics=("arbitrary",)),
        )(x_c, w1_p.astype(cdt), prm, w2_p)

        return out_p if dp == d_out else out_p[:, :d_out]

    # =================== pass 1: partial sum / sum-of-squares ===============
    tm_s = _pick_tm(n, tm_stats, d_in * itemsize, d_in * hp * itemsize)
    nt_s = pl.cdiv(n, tm_s)
    nc = 2 if nt_s >= 2 else 1        # split row tiles over v7x's 2 TensorCores
    nt1 = pl.cdiv(nt_s, nc)

    def stats_kernel(x_ref, w1_ref, psum_ref):
        c = pl.program_id(0)
        i = pl.program_id(1)

        @pl.when(i == 0)
        def _init():
            psum_ref[...] = jnp.zeros_like(psum_ref)

        # Mask tail / clamped-duplicate rows by GLOBAL row index: no wrapper
        # jnp.pad of x is needed (tail block padding values are unspecified).
        row0 = (c * nt1 + i) * tm_s
        rows = lax.broadcasted_iota(jnp.int32, (tm_s, 1), 0) + row0
        xv = jnp.where(rows < n, x_ref[...], 0.0)
        h = jnp.dot(xv, w1_ref[...], preferred_element_type=jnp.float32)
        psum_ref[0:1, :] += jnp.sum(h, axis=0, keepdims=True)
        psum_ref[1:2, :] += jnp.sum(h * h, axis=0, keepdims=True)

    partials = pl.pallas_call(
        stats_kernel,
        out_shape=jax.ShapeDtypeStruct((nc, 2, hp), f32),
        grid=(nc, nt1),
        in_specs=[
            # Clamp the block index so an odd tile count never DMAs a fully
            # out-of-range block; clamped duplicates are zeroed by the mask.
            pl.BlockSpec((tm_s, d_in),
                         lambda c, i: (jnp.minimum(c * nt1 + i, nt_s - 1), 0)),
            pl.BlockSpec((d_in, hp), lambda c, i: (0, 0)),
        ],
        out_specs=pl.BlockSpec((None, 2, hp), lambda c, i: (c, 0, 0)),
        compiler_params=pltpu.CompilerParams(
            dimension_semantics=("parallel", "arbitrary")),
    )(x_c, w1_p.astype(cdt))

    # ---- fold BN into scale/shift once; fold scale into W1 columns --------
    sums = jnp.sum(partials, axis=0)                  # (2, hp)
    mean = sums[0] * inv_n
    var = sums[1] * inv_n - mean * mean               # biased var (training BN)
    scale = gamma_p * lax.rsqrt(var + _BN_EPS)        # 0 on padded lanes
    shift = beta_p - mean * scale
    w1s = (w1_p * scale[None, :]).astype(cdt)         # tiny [d_in, hp] op

    prm = jnp.zeros((8, p), f32)                      # shift + b2: one DMA
    prm = prm.at[0, :hp].set(shift)
    prm = prm.at[1, :dp].set(b2_p)

    # =================== pass 2: x @ W1' + shift, ReLU, @ W2 + b2, ReLU ====
    # Note: W1'/W2 stay fully resident; for very large hidden/output dims
    # (hp*dp*4 approaching the scoped-VMEM limit on v7x) W2 would need a
    # column-tiled grid axis — not needed for typical GIN sizes.
    tm_a = _pick_tm(n, tm_apply,
                    d_in * itemsize + dp * jnp.dtype(x.dtype).itemsize,
                    w_resident)
    nt_a = pl.cdiv(n, tm_a)

    def apply_kernel(x_ref, w1_ref, prm_ref, w2_ref, o_ref):
        h = jnp.dot(x_ref[...], w1_ref[...], preferred_element_type=jnp.float32)
        a = jnp.maximum(h + prm_ref[0:1, :hp], 0.0)        # folded BN + ReLU
        out = jnp.dot(a, w2_ref[...], preferred_element_type=jnp.float32)
        o_ref[...] = jnp.maximum(out + prm_ref[1:2, :dp], 0.0).astype(o_ref.dtype)

    out_p = pl.pallas_call(
        apply_kernel,
        out_shape=jax.ShapeDtypeStruct((n, dp), x.dtype),
        grid=(nt_a,),
        in_specs=[
            pl.BlockSpec((tm_a, d_in), lambda i: (i, 0)),
            pl.BlockSpec((d_in, hp), lambda i: (0, 0)),
            pl.BlockSpec((8, p), lambda i: (0, 0)),
            pl.BlockSpec((hp, dp), lambda i: (0, 0)),
        ],
        out_specs=pl.BlockSpec((tm_a, dp), lambda i: (i, 0)),  # lane-dense store
        compiler_params=pltpu.CompilerParams(
            dimension_semantics=("parallel",)),
    )(x_c, w1s, prm, w2_p)

    return out_p if dp == d_out else out_p[:, :d_out]


def reference(x, w1, b1, gamma, beta, w2, b2):
    """Pure-JAX reference of the PyTorch forward (training-mode BN)."""
    h = x @ w1 + b1
    mean = jnp.mean(h, axis=0, keepdims=True)
    var = jnp.mean((h - mean) ** 2, axis=0, keepdims=True)
    h = (h - mean) / jnp.sqrt(var + _BN_EPS) * gamma + beta
    h = jnp.maximum(h, 0.0)
    out = h @ w2 + b2
    return jnp.maximum(out, 0.0)


def _make_inputs(key, n, d_in, hid, d_out):
    k_x, k_w1, k_b1, k_w2, k_b2 = jax.random.split(key, 5)
    x = jax.random.normal(k_x, (n, d_in), dtype=jnp.float32)
    bound1 = 1.0 / jnp.sqrt(jnp.float32(d_in))
    w1 = jax.random.uniform(k_w1, (d_in, hid), jnp.float32, -bound1, bound1)
    b1 = jax.random.uniform(k_b1, (hid,), jnp.float32, -bound1, bound1)
    gamma = jnp.ones((hid,), jnp.float32)    # BatchNorm1d weight init
    beta = jnp.zeros((hid,), jnp.float32)    # BatchNorm1d bias init
    bound2 = 1.0 / jnp.sqrt(jnp.float32(hid))
    w2 = jax.random.uniform(k_w2, (hid, d_out), jnp.float32, -bound2, bound2)
    b2 = jax.random.uniform(k_b2, (d_out,), jnp.float32, -bound2, bound2)
    return x, w1, b1, gamma, beta, w2, b2


if __name__ == "__main__":
    key = jax.random.PRNGKey(0)
    k1, k2 = jax.random.split(key)

    # --- case 1: small batch -> fused single-kernel fast path --------------
    N, D_IN, HID, D_OUT = 8, 16, 32, 32
    args = _make_inputs(k1, N, D_IN, HID, D_OUT)
    out = jax.block_until_ready(gin_aggr_net(*args))
    ref = reference(*args)
    assert out.shape == (N, D_OUT)
    assert jnp.allclose(out, ref, atol=1e-4, rtol=1e-4), "fused path mismatch"

    # --- case 2: force the two-pass tiled path (tail masking, 2-core split,
    #     partial output tile) with small tiles so every branch is exercised --
    N2, D_OUT2 = 40, 48
    args2 = _make_inputs(k2, N2, D_IN, HID, D_OUT2)
    out2 = jax.block_until_ready(
        gin_aggr_net(*args2, fuse_max_rows=0, tm_stats=8, tm_apply=16))
    ref2 = reference(*args2)
    assert out2.shape == (N2, D_OUT2)
    assert jnp.allclose(out2, ref2, atol=1e-4, rtol=1e-4), "two-pass mismatch"

    print("KERNEL_OK")
</pallas_src>

<mosaic_0001>
module attributes {stable_mosaic.version = 11 : i64} {
  func.func @fused_kernel(%arg0: i32, %arg1: memref<8x16xf32, #tpu.memory_space<vmem>>, %arg2: memref<16x128xf32, #tpu.memory_space<vmem>>, %arg3: memref<8x128xf32, #tpu.memory_space<vmem>>, %arg4: memref<128x128xf32, #tpu.memory_space<vmem>>, %arg5: memref<8x128xf32, #tpu.memory_space<vmem>>) attributes {dimension_semantics = [#tpu.dimension_semantics<arbitrary>], iteration_bounds = array<i64: 1>, scalar_prefetch = 0 : i64, scratch_operands = 0 : i64, tpu.core_type = #tpu.core_type<tc>, window_params = [{pipeline_mode = #tpu.pipeline_mode<synchronous>, transform_indices = @transform_0, window_bounds = array<i64: 8, 16>}, {pipeline_mode = #tpu.pipeline_mode<synchronous>, transform_indices = @transform_1, window_bounds = array<i64: 16, 128>}, {pipeline_mode = #tpu.pipeline_mode<synchronous>, transform_indices = @transform_2, window_bounds = array<i64: 8, 128>}, {pipeline_mode = #tpu.pipeline_mode<synchronous>, transform_indices = @transform_3, window_bounds = array<i64: 128, 128>}, {pipeline_mode = #tpu.pipeline_mode<synchronous>, transform_indices = @transform_4, window_bounds = array<i64: 8, 128>}]} {
    %c0 = arith.constant 0 : index
    %c0_0 = arith.constant 0 : index
    %0 = vector.load %arg1[%c0, %c0_0] : memref<8x16xf32, #tpu.memory_space<vmem>>, vector<8x16xf32>
    %c0_1 = arith.constant 0 : index
    %c0_2 = arith.constant 0 : index
    %1 = vector.load %arg2[%c0_1, %c0_2] : memref<16x128xf32, #tpu.memory_space<vmem>>, vector<16x128xf32>
    %cst = arith.constant dense<0.000000e+00> : vector<8x128xf32>
    %2 = tpu.matmul %0, %1, %cst {dimension_numbers = #tpu.dot_dimension_numbers<[1], [0], [0], [1], [0, 0, 1, 1], [], []>} : vector<8x16xf32>, vector<16x128xf32>, vector<8x128xf32> -> vector<8x128xf32>
    %cst_3 = arith.constant dense<0.000000e+00> : vector<128xf32>
    %3 = vector.multi_reduction <add>, %2, %cst_3 [0] : vector<8x128xf32> to vector<128xf32>
    %4 = vector.shape_cast %3 : vector<128xf32> to vector<1x128xf32>
    %cst_4 = arith.constant 8.000000e+00 : f32
    %5 = vector.broadcast %cst_4 : f32 to vector<1x128xf32>
    %6 = arith.divf %4, %5 : vector<1x128xf32>
    %7 = arith.mulf %2, %2 : vector<8x128xf32>
    %cst_5 = arith.constant dense<0.000000e+00> : vector<128xf32>
    %8 = vector.multi_reduction <add>, %7, %cst_5 [0] : vector<8x128xf32> to vector<128xf32>
    %9 = vector.shape_cast %8 : vector<128xf32> to vector<1x128xf32>
    %cst_6 = arith.constant 8.000000e+00 : f32
    %10 = vector.broadcast %cst_6 : f32 to vector<1x128xf32>
    %11 = arith.divf %9, %10 : vector<1x128xf32>
    %12 = arith.mulf %6, %6 : vector<1x128xf32>
    %13 = arith.subf %11, %12 : vector<1x128xf32>
    %c0_7 = arith.constant 0 : index
    %c0_8 = arith.constant 0 : index
    %14 = vector.load %arg3[%c0_7, %c0_8] : memref<8x128xf32, #tpu.memory_space<vmem>>, vector<1x128xf32>
    %cst_9 = arith.constant 9.99999974E-6 : f32
    %15 = vector.broadcast %cst_9 : f32 to vector<1x128xf32>
    %16 = arith.addf %13, %15 : vector<1x128xf32>
    %17 = math.rsqrt %16 : vector<1x128xf32>
    %18 = arith.mulf %14, %17 : vector<1x128xf32>
    %c1 = arith.constant 1 : index
    %c0_10 = arith.constant 0 : index
    %19 = vector.load %arg3[%c1, %c0_10] : memref<8x128xf32, #tpu.memory_space<vmem>>, vector<1x128xf32>
    %20 = arith.mulf %6, %18 : vector<1x128xf32>
    %21 = arith.subf %19, %20 : vector<1x128xf32>
    %22 = vector.broadcast %18 : vector<1x128xf32> to vector<8x128xf32>
    %23 = arith.mulf %2, %22 : vector<8x128xf32>
    %24 = vector.broadcast %21 : vector<1x128xf32> to vector<8x128xf32>
    %25 = arith.addf %23, %24 : vector<8x128xf32>
    %cst_11 = arith.constant 0.000000e+00 : f32
    %26 = vector.broadcast %cst_11 : f32 to vector<8x128xf32>
    %27 = arith.maximumf %25, %26 : vector<8x128xf32>
    %c0_12 = arith.constant 0 : index
    %c0_13 = arith.constant 0 : index
    %28 = vector.load %arg4[%c0_12, %c0_13] : memref<128x128xf32, #tpu.memory_space<vmem>>, vector<128x128xf32>
    %cst_14 = arith.constant dense<0.000000e+00> : vector<8x128xf32>
    %29 = tpu.matmul %27, %28, %cst_14 {dimension_numbers = #tpu.dot_dimension_numbers<[1], [0], [0], [1], [0, 0, 1, 1], [], []>} : vector<8x128xf32>, vector<128x128xf32>, vector<8x128xf32> -> vector<8x128xf32>
    %c2 = arith.constant 2 : index
    %c0_15 = arith.constant 0 : index
    %30 = vector.load %arg3[%c2, %c0_15] : memref<8x128xf32, #tpu.memory_space<vmem>>, vector<1x128xf32>
    %31 = vector.broadcast %30 : vector<1x128xf32> to vector<8x128xf32>
    %32 = arith.addf %29, %31 : vector<8x128xf32>
    %cst_16 = arith.constant 0.000000e+00 : f32
    %33 = vector.broadcast %cst_16 : f32 to vector<8x128xf32>
    %34 = arith.maximumf %32, %33 : vector<8x128xf32>
    %c0_17 = arith.constant 0 : index
    %c0_18 = arith.constant 0 : index
    %35 = vector.load %arg5[%c0_17, %c0_18] : memref<8x128xf32, #tpu.memory_space<vmem>>, vector<8x128xf32>
    tpu.vector_store %arg5[%c0_17, %c0_18], %34 {strides = array<i32>} : memref<8x128xf32, #tpu.memory_space<vmem>>, vector<8x128xf32>,
    return
  }
  func.func @transform_0(%arg0: i32) -> (i32, i32) {
    %c0_i32 = arith.constant 0 : i32
    %c0_i32_0 = arith.constant 0 : i32
    %c0_i32_1 = arith.constant 0 : i32
    return %c0_i32, %c0_i32_0 : i32, i32
  }
  func.func @transform_1(%arg0: i32) -> (i32, i32) {
    %c0_i32 = arith.constant 0 : i32
    %c0_i32_0 = arith.constant 0 : i32
    %c0_i32_1 = arith.constant 0 : i32
    return %c0_i32, %c0_i32_0 : i32, i32
  }
  func.func @transform_2(%arg0: i32) -> (i32, i32) {
    %c0_i32 = arith.constant 0 : i32
    %c0_i32_0 = arith.constant 0 : i32
    %c0_i32_1 = arith.constant 0 : i32
    return %c0_i32, %c0_i32_0 : i32, i32
  }
  func.func @transform_3(%arg0: i32) -> (i32, i32) {
    %c0_i32 = arith.constant 0 : i32
    %c0_i32_0 = arith.constant 0 : i32
    %c0_i32_1 = arith.constant 0 : i32
    return %c0_i32, %c0_i32_0 : i32, i32
  }
  func.func @transform_4(%arg0: i32) -> (i32, i32) {
    %c0_i32 = arith.constant 0 : i32
    %c0_i32_0 = arith.constant 0 : i32
    %c0_i32_1 = arith.constant 0 : i32
    return %c0_i32, %c0_i32_0 : i32, i32
  }
}

</mosaic_0001>

<bundles_post_ra>
// kernel: tpu_custom_call.1
= control target key start
LH: loop header
LB: loop body
LE: loop exit
PB: predicated region body
PF: predicated region fallthrough
CT: control target
= control target key end

     0   :  { %9 = vsyncpa [#allocation3], 0  ;;  %s614_s0 = inlined_call_operand.hbm [shape: f32[8,16], index: 0, kind: input, shape index: {}]   ;;  %s615_s1 = inlined_call_operand.hbm [shape: f32[16,128], index: 1, kind: input, shape index: {}]   ;;  %s616_s2 = inlined_call_operand.hbm [shape: f32[8,128], index: 2, kind: input, shape index: {}]   ;;  %s617_s3 = inlined_call_operand.hbm [shape: f32[128,128], index: 3, kind: input, shape index: {}]   ;;  %s618_s4 = inlined_call_operand.hbm [shape: f32[8,128], index: 4, kind: output, shape index: {}]  }
   0x1   :  { %10 = vsyncpa [#allocation6], 0 }
   0x2   :  { %11 = vsyncpa [#allocation9], 0 }
   0x3   :  { %12 = vsyncpa [#allocation4], 0  ;;  %s513_s15 = smov [#allocation5]   ;;  %s395_s19 = scalar_lea.hbm %s615_s1, 256 }
   0x4   :  { %s28_s16 = sshll.u32 %s513_s15, 4  ;;  %p396_p0 = scmp.ne.s32.totalorder %s615_s1, %s395_s19  ;;  %s29_s16 = int_to_ptr.vmem [resolvable:$true] %s28_s16 }
   0x5   :  { %p399_p1 = scmp.lt.u32.totalorder %s395_s19, %s615_s1 }
   0x7   :  { %p401_p2 = pnand %p399_p1, %p396_p0 }
   0x9   :  { %404 = shalt.err (!%p401_p2)
}
   0xa   :  { %s405_s24 = scalar_lea.vmem %s29_s16, 256  ;;  %p410_p4 = scmp.lt.s32.totalorder %s29_s16, %s29_s16 }
   0xb   :  { %p406_p3 = scmp.ne.s32.totalorder %s29_s16, %s405_s24  ;;  %p411_p5 = scmp.lt.s32.totalorder %s405_s24, %s405_s24 }
   0xd   :  { %p412_p6 = por %p411_p5, %p410_p4 }
   0xf   :  { %p413_p7 = pnand %p412_p6, %p406_p3 }
  0x11   :  { %416 = shalt.err (!%p413_p7)
}
  0x12   :  { %s514_s25 = smov 128   ;;  %s515_s26 = smov 8  }
  0x13   :  { %34 = dma.hbm_to_vmem [thread:$0]  %s615_s1, 256, %s29_s16, [#allocation6], %s514_s25, %s514_s25, %s515_s26  }
  0x14   :  { %s516_s29 = smov [#allocation2]   ;;  %s517_s5 = smov [#allocation7]  }
  0x15   :  { %s19_s30 = sshll.u32 %s516_s29, 4  ;;  %s41_s6 = sshll.u32 %s517_s5, 4  ;;  %s20_s30 = int_to_ptr.vmem [resolvable:$true] %s19_s30  ;;  %s42_s6 = int_to_ptr.vmem [resolvable:$true] %s41_s6 }
  0x16   :  { %s417_s9 = scalar_lea.hbm %s614_s0, 128 }
  0x17   :  { %p418_p8 = scmp.ne.s32.totalorder %s614_s0, %s417_s9  ;;  %p421_p9 = scmp.lt.u32.totalorder %s417_s9, %s614_s0 }
  0x19   :  { %p423_p10 = pnand %p421_p9, %p418_p8 }
  0x1b   :  { %426 = shalt.err (!%p423_p10)
}
  0x1c   :  { %s427_s1 = scalar_lea.vmem %s20_s30, 128  ;;  %p432_p12 = scmp.lt.s32.totalorder %s20_s30, %s20_s30 }
  0x1d   :  { %p428_p11 = scmp.ne.s32.totalorder %s20_s30, %s427_s1  ;;  %p433_p13 = scmp.lt.s32.totalorder %s427_s1, %s427_s1 }
  0x1f   :  { %p434_p0 = por %p433_p13, %p432_p12 }
  0x21   :  { %p435_p1 = pnand %p434_p0, %p428_p11 }
  0x23   :  { %438 = shalt.err (!%p435_p1)
}
  0x24   :  { %22 = dma.hbm_to_vmem [thread:$0]  %s614_s0, 128, %s20_s30, [#allocation3]  }
  0x25   :  { %s439_s18 = scalar_lea.hbm %s616_s2, 128 }
  0x26   :  { %p440_p2 = scmp.ne.s32.totalorder %s616_s2, %s439_s18  ;;  %p443_p3 = scmp.lt.u32.totalorder %s439_s18, %s616_s2 }
  0x28   :  { %p445_p4 = pnand %p443_p3, %p440_p2 }
  0x2a   :  { %448 = shalt.err (!%p445_p4)
}
  0x2b   :  { %s449_s23 = scalar_lea.vmem %s42_s6, 128  ;;  %p454_p6 = scmp.lt.s32.totalorder %s42_s6, %s42_s6 }
  0x2c   :  { %p450_p5 = scmp.ne.s32.totalorder %s42_s6, %s449_s23  ;;  %p455_p7 = scmp.lt.s32.totalorder %s449_s23, %s449_s23 }
  0x2e   :  { %p456_p8 = por %p455_p7, %p454_p6 }
  0x30   :  { %p457_p9 = pnand %p456_p8, %p450_p5 }
  0x32   :  { %460 = shalt.err (!%p457_p9)
}
  0x33   :  { %44 = dma.hbm_to_vmem [thread:$0]  %s616_s2, 128, %s42_s6, [#allocation6]  }
  0x34   :  { %s518_s27 = smov [#allocation8]   ;;  %s461_s5 = scalar_lea.hbm %s617_s3, 2048 }
  0x35   :  { %s50_s28 = sshll.u32 %s518_s27, 4  ;;  %p462_p10 = scmp.ne.s32.totalorder %s617_s3, %s461_s5  ;;  %s51_s28 = int_to_ptr.vmem [resolvable:$true] %s50_s28 }
  0x36   :  { %p465_p11 = scmp.lt.u32.totalorder %s461_s5, %s617_s3 }
  0x38   :  { %p467_p12 = pnand %p465_p11, %p462_p10 }
  0x3a   :  { %470 = shalt.err (!%p467_p12)
}
  0x3b   :  { %s471_s11 = scalar_lea.vmem %s51_s28, 2048  ;;  %p476_p0 = scmp.lt.s32.totalorder %s51_s28, %s51_s28 }
  0x3c   :  { %p472_p13 = scmp.ne.s32.totalorder %s51_s28, %s471_s11  ;;  %p477_p1 = scmp.lt.s32.totalorder %s471_s11, %s471_s11 }
  0x3e   :  { %p478_p2 = por %p477_p1, %p476_p0 }
  0x40   :  { %p479_p3 = pnand %p478_p2, %p472_p13 }
  0x42   :  { %482 = shalt.err (!%p479_p3)
}
  0x43   :  { %56 = dma.hbm_to_vmem [thread:$0]  %s617_s3, 2048, %s51_s28, [#allocation9], %s514_s25, %s514_s25, %s515_s26  }
  0x44   :  { %505 = dma.done.wait [#allocation3], 128  }
  0x45   :  { %506 = vsyncadd [#allocation3], 4294967168 }
  0x46   :  { %507 = dma.done.wait [#allocation6], 384  }
  0x47   :  { %508 = vsyncadd [#allocation6], 4294966912 }
  0x48   :  { %509 = dma.done.wait [#allocation9], 2048  }
  0x49   :  { %510 = vsyncadd [#allocation9], 4294965248  ;;  %v519_v0 = vmov 0.0|0.0   ;;  %vm520_vm0 = vmmov 0   ;;  %v521_v1 = vmov 0.0   ;;  %v70_v2 = vld [vmem:[#allocation5] sm:$0xff]  ;;  %v171_v50 = vlaneseq }
  0x4a   :  { %356 = vmatprep.subr.bf16.mxu0 %v519_v0  ;;  %318 = vmatprep.mubr.msk.f32.mxu0 %vm520_vm0, %v521_v1  ;;  %v71_v3 = vld [vmem:[#allocation5 + $0x8] sm:$0xff]  ;;  %v69_v5 = vld [vmem:[#allocation2] sm:$0xff]  ;;  %vm72_vm1 = vcmask 130048   ;;  %v183_v7 = vld [vmem:[#allocation8 + $0x8] sm:$0xff]  ;;  %s522_s3 = smov [#allocation10]  }
  0x4b   :  { %359 = vmatprep.subr.bf16.mxu1 %v519_v0  ;;  %353 = vmatprep.mubr.msk.f32.mxu1 %vm520_vm0, %v521_v1  ;;  %v357_v4 = vpack.c.bf16 %v71_v3, %v70_v2  ;;  %v182_v6 = vld [vmem:[#allocation8] sm:$0xff]  ;;  %v184_v9 = vld [vmem:[#allocation8 + $0x10] sm:$0xff]  ;;  %v185_v10 = vld [vmem:[#allocation8 + $0x18] sm:$0xff]  ;;  %v172_v51 = vshrl.u32 %v171_v50, 7  ;;  %s281_s25 = sshll.u32 %s522_s3, 4  ;;  %s282_s25 = int_to_ptr.vmem [resolvable:$true] %s281_s25 }
  0x4c   :  { %v360_v8 = vpack.c.bf16 %v183_v7, %v182_v6  ;;  %v363_v11 = vpack.c.bf16 %v185_v10, %v184_v9  ;;  %v186_v12 = vld [vmem:[#allocation8 + $0x20] sm:$0xff]  ;;  %v187_v13 = vld [vmem:[#allocation8 + $0x28] sm:$0xff]  ;;  %v188_v15 = vld [vmem:[#allocation8 + $0x30] sm:$0xff]  ;;  %s483_s26 = scalar_lea.vmem %s282_s25, 128  ;;  %p488_p5 = scmp.lt.s32.totalorder %s282_s25, %s282_s25 }
  0x4d   :  { %358 = vmatpush3.bf16.msra.mxu0 %v357_v4  ;;  %v366_v14 = vpack.c.bf16 %v187_v13, %v186_v12  ;;  %v189_v16 = vld [vmem:[#allocation8 + $0x38] sm:$0xff]  ;;  %v190_v18 = vld [vmem:[#allocation8 + $0x40] sm:$0xff]  ;;  %v191_v19 = vld [vmem:[#allocation8 + $0x48] sm:$0xff]  ;;  %v173_v53 = vsub.s32 0, %v172_v51  ;;  %p484_p4 = scmp.ne.s32.totalorder %s282_s25, %s483_s26  ;;  %p489_p6 = scmp.lt.s32.totalorder %s483_s26, %s483_s26 }
  0x4e   :  { %361 = vmatpush3.bf16.msra.mxu1 %v360_v8  ;;  %v369_v17 = vpack.c.bf16 %v189_v16, %v188_v15  ;;  %v372_v20 = vpack.c.bf16 %v191_v19, %v190_v18  ;;  %v192_v21 = vld [vmem:[#allocation8 + $0x50] sm:$0xff]  ;;  %v193_v22 = vld [vmem:[#allocation8 + $0x58] sm:$0xff]  ;;  %v194_v24 = vld [vmem:[#allocation8 + $0x60] sm:$0xff] }
  0x4f   :  { %362 = vmatprep.subr.bf16.mxu1 %v519_v0  ;;  %v375_v23 = vpack.c.bf16 %v193_v22, %v192_v21  ;;  %v195_v25 = vld [vmem:[#allocation8 + $0x68] sm:$0xff]  ;;  %v196_v27 = vld [vmem:[#allocation8 + $0x70] sm:$0xff]  ;;  %v197_v28 = vld [vmem:[#allocation8 + $0x78] sm:$0xff]  ;;  %p490_p7 = por %p489_p6, %p488_p5 }
  0x50   :  { %319 = vmatmul.mubr.msk.f32.vlgmr.msra.gmra.mrb[0].mxu0 %vm72_vm1, %v69_v5  ;;  %v378_v26 = vpack.c.bf16 %v195_v25, %v194_v24  ;;  %v381_v29 = vpack.c.bf16 %v197_v28, %v196_v27  ;;  %v164_v52 = vld [vmem:[#allocation7] sm:$0x1]  ;;  %v168_v56 = vld [vmem:[#allocation7 + $0x1] sm:$0x1] }
  0x51   :  { %p491_p8 = pnand %p490_p7, %p484_p4 }
  0x52   :  { %364 = vmatpush3.bf16.msra.mxu1 %v363_v11 }
  0x53   :  { %365 = vmatprep.subr.bf16.mxu1 %v519_v0 }
  0x56   :  { %367 = vmatpush3.bf16.msra.mxu1 %v366_v14 }
  0x57   :  { %368 = vmatprep.subr.bf16.mxu1 %v519_v0 }
  0x5a   :  { %370 = vmatpush3.bf16.msra.mxu1 %v369_v17 }
  0x5b   :  { %371 = vmatprep.subr.bf16.mxu1 %v519_v0 }
  0x5e   :  { %373 = vmatpush3.bf16.msra.mxu1 %v372_v20 }
  0x5f   :  { %374 = vmatprep.subr.bf16.mxu1 %v519_v0 }
  0x62   :  { %376 = vmatpush3.bf16.msra.mxu1 %v375_v23 }
  0x63   :  { %377 = vmatprep.subr.bf16.mxu1 %v519_v0 }
  0x66   :  { %379 = vmatpush3.bf16.msra.mxu1 %v378_v26 }
  0x67   :  { %380 = vmatprep.subr.bf16.mxu1 %v519_v0  ;;  %v293_v0 = vld [vmem:[#allocation7 + $0x2] ss:$0 sm:$0xff] }
  0x6a   :  { %382 = vmatpush3.bf16.msra.mxu1 %v381_v29 }
 0x123   :  { %v142_v30 = vpop.f32.mrb[0].mxu0 }
 0x124   :  { %v146_v31 = vrot.slane %v142_v30, 4  ;;  %v154_v32 = vmul.f32 %v142_v30, %v142_v30  ;;  %v320_v33 = vpop.f32.mrb[1].mxu0 }
 0x126   :  { %v147_v34 = vadd.f32 %v146_v31, %v142_v30  ;;  %v155_v35 = vrot.slane %v154_v32, 4 }
 0x128   :  { %v148_v36 = vrot.slane %v147_v34, 2  ;;  %v156_v37 = vadd.f32 %v155_v35, %v154_v32 }
 0x12a   :  { %v149_v38 = vadd.f32 %v148_v36, %v147_v34  ;;  %v157_v39 = vrot.slane %v156_v37, 2 }
 0x12c   :  { %v150_v40 = vrot.slane %v149_v38, 1  ;;  %v158_v41 = vadd.f32 %v157_v39, %v156_v37 }
 0x12e   :  { %v151_v42 = vadd.f32 %v150_v40, %v149_v38  ;;  %v159_v43 = vrot.slane %v158_v41, 1 }
 0x130   :  { %v153_v44 = vmul.f32 0.125, %v151_v42  ;;  %v160_v45 = vadd.f32 %v159_v43, %v158_v41 }
 0x132   :  { %v161_v46 = vmul.f32 0.125, %v160_v45  ;;  %v162_v47 = vmul.f32 %v153_v44, %v153_v44 }
 0x134   :  { %v163_v48 = vsub.f32 %v161_v46, %v162_v47 }
 0x136   :  { %v165_v49 = vadd.f32 1e-05, %v163_v48 }
 0x138   :  { %393 = vrsqrt.f32 %v165_v49 }
 0x142   :  { %v394_v54 = vpop.eup %393 }
 0x143   :  { %v167_v55 = vmul.f32 %v394_v54, %v164_v52 }
 0x145   :  { %v174_v57 = vrot.slane %v167_v55, %v173_v53  ;;  %v169_v58 = vmul.f32 %v167_v55, %v153_v44 }
 0x147   :  { %v170_v59 = vsub.f32 %v168_v56, %v169_v58  ;;  %v175_v60 = vmul.f32 %v174_v57, %v142_v30 }
 0x149   :  { %v179_v61 = vrot.slane %v170_v59, %v173_v53 }
 0x14b   :  { %v180_v62 = vadd.f32 %v179_v61, %v175_v60 }
 0x14d   :  { %v181_v63 = vmax.f32 %v180_v62, 0.0 }
 0x14f   :  { %354 = vmatmul.mubr.f32.vlgmr.msra.gmra.mrb[0].mxu1 %v181_v63 }
 0x222   :  { %v269_v1 = vpop.f32.mrb[0].mxu1 }
 0x223   :  { %v270_v2 = vadd.f32 %v293_v0, %v269_v1  ;;  %v355_v3 = vpop.f32.mrb[1].mxu1 }
 0x225   :  { %v273_v4 = vmax.f32 %v270_v2, 0.0 }
 0x227   :  { %274 = vst [vmem:[#allocation10] sm:$0xff] %v273_v4 }
 0x228   :  { %494 = shalt.err (!%p491_p8)
}
 0x229   :  { %s495_s1 = scalar_lea.hbm %s618_s4, 128 }
 0x22a   :  { %p496_p9 = scmp.ne.s32.totalorder %s618_s4, %s495_s1  ;;  %p499_p10 = scmp.lt.u32.totalorder %s495_s1, %s618_s4 }
 0x22c   :  { %p501_p11 = pnand %p499_p10, %p496_p9 }
 0x22e   :  { %504 = shalt.err (!%p501_p11)
}
 0x22f   :  { %284 = dma.vmem_to_hbm [thread:$0]  %s282_s25, 128, %s618_s4, [#allocation4]  }
 0x230   :  { %511 = dma.done.wait [#allocation4], 128  }
 0x231   :  { %512 = vsyncadd [#allocation4], 4294967168 }
 0x232   :  { %288 = vsyncpa [#allocation3], 1 }
 0x233   :  { %289 = vsyncpa [#allocation6], 1 }
 0x234   :  { %290 = vsyncpa [#allocation9], 1 }
 0x235   :  { %291 = vsyncpa [#allocation4], 1 }

</bundles_post_ra>
